<compile_context>
chip_gen: v7x
topology: tpu7x:2x2x1
jax: 0.10.0
libtpu: 0.0.40
codegen_flags: <defaults>
</compile_context>

<pallas_src>
import math
from collections import namedtuple

import jax
import jax.numpy as jnp
from jax.experimental import pallas as pl
from jax.experimental.pallas import tpu as pltpu

_LANE = 128     # vreg lane width
_SUBLANE = 8    # f32 sublane count


def _round_up(n, m):
    return ((n + m - 1) // m) * m


def _cdiv(a, b):
    return -(-a // b)


def _make_mlp_kernel(num_linear_layers, acc_dtype=jnp.float32):
    """Fused MLP kernel for `num_linear_layers` Linear layers.

    Ref order: (x_ref, w0, b0, w1, b1, ..., w_{L-1}, b_{L-1}, out_ref).
    ReLU after every layer except the last (matches the PyTorch module).
    MXU operands are cast to the weight dtype (bf16 by default); bias-add,
    ReLU and accumulation stay in f32.
    """

    def kernel(*refs):
        x_ref = refs[0]
        o_ref = refs[-1]
        h = x_ref[...]
        for i in range(num_linear_layers):
            w = refs[1 + 2 * i][...]
            b = refs[2 + 2 * i][...]
            h = jnp.dot(h.astype(w.dtype), w,
                        preferred_element_type=acc_dtype)
            h = h + b.astype(acc_dtype)
            if i < num_linear_layers - 1:
                h = jnp.maximum(h, 0.0)  # F.relu
        o_ref[...] = h.astype(o_ref.dtype)

    return kernel


PreparedParams = namedtuple("PreparedParams", ["layers", "in_size", "out_size"])


def prepare_garment_classifier_params(params):
    """One-time layout/padding of parameters (do NOT call per forward step).

    params: list of (W, b) with W: (in, out), b: (1, out) or (out,), forward order.

    * Hidden widths stay at native size (no 32 -> 128 inflation of W0 bytes).
    * First layer fan_in is padded to a multiple of 128 only if misaligned.
    * Last layer fan_out (and its bias) is padded to a multiple of 128 so the
      kernel's output store is an unmasked, lane-dense vst.
    * Biases are stored as (1, out) f32.
    """
    num_layers = len(params)
    in_size = int(params[0][0].shape[0])
    out_size = int(params[-1][0].shape[1])
    in_p = _round_up(in_size, _LANE)
    out_p = _round_up(out_size, _LANE)

    layers = []
    for i, (w, b) in enumerate(params):
        fi, fo = w.shape
        fi_p = in_p if i == 0 else fi
        fo_p = out_p if i == num_layers - 1 else fo
        if (fi_p, fo_p) != (fi, fo):
            w = jnp.pad(w, ((0, fi_p - fi), (0, fo_p - fo)))
        b = jnp.asarray(b).reshape(1, fo).astype(jnp.float32)
        if fo_p != fo:
            b = jnp.pad(b, ((0, 0), (0, fo_p - fo)))
        layers.append((w, b))
    return PreparedParams(tuple(layers), in_size, out_size)


def garment_classifier_forward(x, prepared, *, batch_tile=512,
                               single_buffer_weights=False):
    """Forward pass of GarmentClassifier.

    x:        (B, ...) array, flattened to (B, input_size) like x.view(B, -1).
    prepared: PreparedParams from prepare_garment_classifier_params.
    Returns (B, output_size) float32 logits.
    """
    layers = prepared.layers
    in_size, out_size = prepared.in_size, prepared.out_size
    in_p = layers[0][0].shape[0]      # (possibly) padded input feature dim
    out_p = layers[-1][1].shape[1]    # padded output feature dim (mult of 128)

    B = x.shape[0]
    x2 = x.reshape(B, -1).astype(jnp.float32)
    assert x2.shape[1] == in_size, (x2.shape, in_size)

    # ---- Batch tile: multiple of 8 sublanes, capped by batch_tile. --------
    tb = _round_up(min(batch_tile, max(B, _SUBLANE)), _SUBLANE)
    # Keep >= 2 grid steps when the batch allows it so ("parallel",) can use
    # both v7x TensorCores instead of idling one.
    if B >= 2 * _SUBLANE and _cdiv(B, tb) < 2:
        tb = _round_up(_cdiv(B, 2), _SUBLANE)
    b_pad = _round_up(B, tb)

    # ---- Pad activations only when actually needed (kernel is HBM-bound). -
    if b_pad != B or in_p != in_size:
        x2 = jnp.pad(x2, ((0, b_pad - B), (0, in_p - in_size)))

    num_layers = len(layers)
    kernel = _make_mlp_kernel(num_layers)

    flat_inputs = [x2]
    for (w, b) in layers:
        flat_inputs.append(w)
        flat_inputs.append(b)

    grid = (b_pad // tb,)
    # Activations: blocked over batch, software-pipelined across grid steps.
    # (For very large per-step activation DMA on v6e, consider
    #  pipeline_mode=pl.Buffered(3) here.)
    in_specs = [pl.BlockSpec((tb, in_p), lambda i: (i, 0))]
    # Weights / biases: full-array blocks, constant index_map -> VMEM-resident.
    wkw = {"pipeline_mode": pl.Buffered(1)} if single_buffer_weights else {}
    for (w, b) in layers:
        in_specs.append(pl.BlockSpec(w.shape, lambda i: (0, 0), **wkw))
        in_specs.append(pl.BlockSpec(b.shape, lambda i: (0, 0), **wkw))
    out_spec = pl.BlockSpec((tb, out_p), lambda i: (i, 0))

    # ---- VMEM budget: buffered blocks + resident weights + slack, capped to
    #      ~75% of this generation's physical VMEM (v7x: 64 MiB, v5e/v6e: 128).
    act_bytes = 2 * (tb * in_p + tb * out_p) * 4
    wmult = 1 if single_buffer_weights else 2
    wgt_bytes = wmult * sum(int(w.size) * w.dtype.itemsize +
                            int(b.size) * b.dtype.itemsize
                            for (w, b) in layers)
    try:
        vmem_cap = int(getattr(pltpu.get_tpu_info(),
                               "vmem_capacity_bytes", 64 << 20))
    except Exception:
        vmem_cap = 64 << 20
    vmem_limit = min(max(int(1.5 * (act_bytes + wgt_bytes)) + (4 << 20),
                         16 << 20),
                     int(0.75 * vmem_cap))

    out_padded = pl.pallas_call(
        kernel,
        out_shape=jax.ShapeDtypeStruct((b_pad, out_p), jnp.float32),
        grid=grid,
        in_specs=in_specs,
        out_specs=out_spec,
        compiler_params=pltpu.CompilerParams(
            dimension_semantics=("parallel",),
            vmem_limit_bytes=vmem_limit,
        ),
    )(*flat_inputs)

    return out_padded[:B, :out_size]


def init_garment_classifier_params(
    key, input_size, hidden_size, output_size, num_hidden_layers=2,
    hidden_layer_width=None, param_dtype=jnp.bfloat16,
):
    """PyTorch-style init: U(-1/sqrt(fan_in), 1/sqrt(fan_in)).

    W stored as (in, out) (transpose of nn.Linear), b as (1, out) f32.
    bf16 weight storage is the default: MXU takes bf16 natively on
    v5e/v6e/v7x and it halves the dominant weight HBM traffic.
    # TODO(synk): optional fp8 (e4m3) weight storage for v7x only.
    """
    if hidden_layer_width is None:
        hidden_layer_width = hidden_size

    dims = [(input_size, hidden_size),
            (hidden_size, hidden_layer_width)]
    for _ in range(num_hidden_layers - 1):
        dims.append((hidden_layer_width, hidden_layer_width))
    dims.append((hidden_layer_width, output_size))

    params = []
    for (fan_in, fan_out) in dims:
        key, kw, kb = jax.random.split(key, 3)
        bound = 1.0 / math.sqrt(fan_in)
        w = jax.random.uniform(
            kw, (fan_in, fan_out), jnp.float32, minval=-bound, maxval=bound)
        b = jax.random.uniform(
            kb, (1, fan_out), jnp.float32, minval=-bound, maxval=bound)
        params.append((w.astype(param_dtype), b.astype(jnp.float32)))
    return params


def reference_forward(x, params):
    """Pure-JAX reference mirroring the PyTorch forward (f32 accumulation,
    operands cast to the stored weight dtype, same as the kernel)."""
    h = x.reshape(x.shape[0], -1).astype(jnp.float32)
    for i, (w, b) in enumerate(params):
        h = jnp.dot(h.astype(w.dtype), w,
                    preferred_element_type=jnp.float32) + b.astype(jnp.float32)
        if i < len(params) - 1:
            h = jnp.maximum(h, 0.0)
    return h


if __name__ == "__main__":
    key = jax.random.PRNGKey(0)
    k_x, k_p = jax.random.split(key)

    # Small shapes consistent with the module: NCHW image input, flattened.
    B, C, H, W = 2, 4, 16, 16
    input_size = C * H * W      # 1024
    hidden_size = 32
    output_size = 10
    num_hidden_layers = 2

    x = jax.random.normal(k_x, (B, C, H, W), dtype=jnp.float32)
    params = init_garment_classifier_params(
        k_p, input_size, hidden_size, output_size, num_hidden_layers)

    prepared = prepare_garment_classifier_params(params)  # one-time padding
    out = garment_classifier_forward(x, prepared)
    out = jax.block_until_ready(out)

    ref = reference_forward(x, params)
    assert out.shape == (B, output_size), out.shape
    # bf16 weights on both sides; tolerance guards reduction-order differences.
    assert jnp.allclose(out, ref, atol=1e-2, rtol=1e-2), \
        jnp.max(jnp.abs(out - ref))

    print("KERNEL_OK")
</pallas_src>

<mosaic_0001>
module attributes {stable_mosaic.version = 11 : i64} {
  func.func @kernel(%arg0: i32, %arg1: memref<8x1024xf32, #tpu.memory_space<vmem>>, %arg2: memref<1024x32xbf16, #tpu.memory_space<vmem>>, %arg3: memref<1x32xf32, #tpu.memory_space<vmem>>, %arg4: memref<32x32xbf16, #tpu.memory_space<vmem>>, %arg5: memref<1x32xf32, #tpu.memory_space<vmem>>, %arg6: memref<32x32xbf16, #tpu.memory_space<vmem>>, %arg7: memref<1x32xf32, #tpu.memory_space<vmem>>, %arg8: memref<32x128xbf16, #tpu.memory_space<vmem>>, %arg9: memref<1x128xf32, #tpu.memory_space<vmem>>, %arg10: memref<8x128xf32, #tpu.memory_space<vmem>>) attributes {dimension_semantics = [#tpu.dimension_semantics<parallel>], iteration_bounds = array<i64: 1>, scalar_prefetch = 0 : i64, scratch_operands = 0 : i64, tpu.core_type = #tpu.core_type<tc>, window_params = [{transform_indices = @transform_0, window_bounds = array<i64: 8, 1024>}, {pipeline_mode = #tpu.pipeline_mode<synchronous>, transform_indices = @transform_1, window_bounds = array<i64: 1024, 32>}, {pipeline_mode = #tpu.pipeline_mode<synchronous>, transform_indices = @transform_2, window_bounds = array<i64: 1, 32>}, {pipeline_mode = #tpu.pipeline_mode<synchronous>, transform_indices = @transform_3, window_bounds = array<i64: 32, 32>}, {pipeline_mode = #tpu.pipeline_mode<synchronous>, transform_indices = @transform_4, window_bounds = array<i64: 1, 32>}, {pipeline_mode = #tpu.pipeline_mode<synchronous>, transform_indices = @transform_5, window_bounds = array<i64: 32, 32>}, {pipeline_mode = #tpu.pipeline_mode<synchronous>, transform_indices = @transform_6, window_bounds = array<i64: 1, 32>}, {pipeline_mode = #tpu.pipeline_mode<synchronous>, transform_indices = @transform_7, window_bounds = array<i64: 32, 128>}, {pipeline_mode = #tpu.pipeline_mode<synchronous>, transform_indices = @transform_8, window_bounds = array<i64: 1, 128>}, {transform_indices = @transform_9, window_bounds = array<i64: 8, 128>}]} {
    %c0 = arith.constant 0 : index
    %c0_0 = arith.constant 0 : index
    %0 = vector.load %arg1[%c0, %c0_0] : memref<8x1024xf32, #tpu.memory_space<vmem>>, vector<8x1024xf32>
    %c0_1 = arith.constant 0 : index
    %c0_2 = arith.constant 0 : index
    %1 = vector.load %arg2[%c0_1, %c0_2] : memref<1024x32xbf16, #tpu.memory_space<vmem>>, vector<1024x32xbf16>
    %c0_3 = arith.constant 0 : index
    %c0_4 = arith.constant 0 : index
    %2 = vector.load %arg3[%c0_3, %c0_4] : memref<1x32xf32, #tpu.memory_space<vmem>>, vector<1x32xf32>
    %3 = arith.truncf %0 : vector<8x1024xf32> to vector<8x1024xbf16>
    %cst = arith.constant dense<0.000000e+00> : vector<8x32xf32>
    %4 = tpu.matmul %3, %1, %cst {dimension_numbers = #tpu.dot_dimension_numbers<[1], [0], [0], [1], [0, 0, 1, 1], [], []>} : vector<8x1024xbf16>, vector<1024x32xbf16>, vector<8x32xf32> -> vector<8x32xf32>
    %5 = vector.broadcast %2 : vector<1x32xf32> to vector<8x32xf32>
    %6 = arith.addf %4, %5 : vector<8x32xf32>
    %cst_5 = arith.constant 0.000000e+00 : f32
    %7 = vector.broadcast %cst_5 : f32 to vector<8x32xf32>
    %8 = arith.maximumf %6, %7 : vector<8x32xf32>
    %c0_6 = arith.constant 0 : index
    %c0_7 = arith.constant 0 : index
    %9 = vector.load %arg4[%c0_6, %c0_7] : memref<32x32xbf16, #tpu.memory_space<vmem>>, vector<32x32xbf16>
    %c0_8 = arith.constant 0 : index
    %c0_9 = arith.constant 0 : index
    %10 = vector.load %arg5[%c0_8, %c0_9] : memref<1x32xf32, #tpu.memory_space<vmem>>, vector<1x32xf32>
    %11 = arith.truncf %8 : vector<8x32xf32> to vector<8x32xbf16>
    %cst_10 = arith.constant dense<0.000000e+00> : vector<8x32xf32>
    %12 = tpu.matmul %11, %9, %cst_10 {dimension_numbers = #tpu.dot_dimension_numbers<[1], [0], [0], [1], [0, 0, 1, 1], [], []>} : vector<8x32xbf16>, vector<32x32xbf16>, vector<8x32xf32> -> vector<8x32xf32>
    %13 = vector.broadcast %10 : vector<1x32xf32> to vector<8x32xf32>
    %14 = arith.addf %12, %13 : vector<8x32xf32>
    %cst_11 = arith.constant 0.000000e+00 : f32
    %15 = vector.broadcast %cst_11 : f32 to vector<8x32xf32>
    %16 = arith.maximumf %14, %15 : vector<8x32xf32>
    %c0_12 = arith.constant 0 : index
    %c0_13 = arith.constant 0 : index
    %17 = vector.load %arg6[%c0_12, %c0_13] : memref<32x32xbf16, #tpu.memory_space<vmem>>, vector<32x32xbf16>
    %c0_14 = arith.constant 0 : index
    %c0_15 = arith.constant 0 : index
    %18 = vector.load %arg7[%c0_14, %c0_15] : memref<1x32xf32, #tpu.memory_space<vmem>>, vector<1x32xf32>
    %19 = arith.truncf %16 : vector<8x32xf32> to vector<8x32xbf16>
    %cst_16 = arith.constant dense<0.000000e+00> : vector<8x32xf32>
    %20 = tpu.matmul %19, %17, %cst_16 {dimension_numbers = #tpu.dot_dimension_numbers<[1], [0], [0], [1], [0, 0, 1, 1], [], []>} : vector<8x32xbf16>, vector<32x32xbf16>, vector<8x32xf32> -> vector<8x32xf32>
    %21 = vector.broadcast %18 : vector<1x32xf32> to vector<8x32xf32>
    %22 = arith.addf %20, %21 : vector<8x32xf32>
    %cst_17 = arith.constant 0.000000e+00 : f32
    %23 = vector.broadcast %cst_17 : f32 to vector<8x32xf32>
    %24 = arith.maximumf %22, %23 : vector<8x32xf32>
    %c0_18 = arith.constant 0 : index
    %c0_19 = arith.constant 0 : index
    %25 = vector.load %arg8[%c0_18, %c0_19] : memref<32x128xbf16, #tpu.memory_space<vmem>>, vector<32x128xbf16>
    %c0_20 = arith.constant 0 : index
    %c0_21 = arith.constant 0 : index
    %26 = vector.load %arg9[%c0_20, %c0_21] : memref<1x128xf32, #tpu.memory_space<vmem>>, vector<1x128xf32>
    %27 = arith.truncf %24 : vector<8x32xf32> to vector<8x32xbf16>
    %cst_22 = arith.constant dense<0.000000e+00> : vector<8x128xf32>
    %28 = tpu.matmul %27, %25, %cst_22 {dimension_numbers = #tpu.dot_dimension_numbers<[1], [0], [0], [1], [0, 0, 1, 1], [], []>} : vector<8x32xbf16>, vector<32x128xbf16>, vector<8x128xf32> -> vector<8x128xf32>
    %29 = vector.broadcast %26 : vector<1x128xf32> to vector<8x128xf32>
    %30 = arith.addf %28, %29 : vector<8x128xf32>
    %c0_23 = arith.constant 0 : index
    %c0_24 = arith.constant 0 : index
    %31 = vector.load %arg10[%c0_23, %c0_24] : memref<8x128xf32, #tpu.memory_space<vmem>>, vector<8x128xf32>
    tpu.vector_store %arg10[%c0_23, %c0_24], %30 {strides = array<i32>} : memref<8x128xf32, #tpu.memory_space<vmem>>, vector<8x128xf32>,
    return
  }
  func.func @transform_0(%arg0: i32) -> (i32, i32) {
    %c0_i32 = arith.constant 0 : i32
    %c0_i32_0 = arith.constant 0 : i32
    return %arg0, %c0_i32 : i32, i32
  }
  func.func @transform_1(%arg0: i32) -> (i32, i32) {
    %c0_i32 = arith.constant 0 : i32
    %c0_i32_0 = arith.constant 0 : i32
    %c0_i32_1 = arith.constant 0 : i32
    return %c0_i32, %c0_i32_0 : i32, i32
  }
  func.func @transform_2(%arg0: i32) -> (i32, i32) {
    %c0_i32 = arith.constant 0 : i32
    %c0_i32_0 = arith.constant 0 : i32
    %c0_i32_1 = arith.constant 0 : i32
    return %c0_i32, %c0_i32_0 : i32, i32
  }
  func.func @transform_3(%arg0: i32) -> (i32, i32) {
    %c0_i32 = arith.constant 0 : i32
    %c0_i32_0 = arith.constant 0 : i32
    %c0_i32_1 = arith.constant 0 : i32
    return %c0_i32, %c0_i32_0 : i32, i32
  }
  func.func @transform_4(%arg0: i32) -> (i32, i32) {
    %c0_i32 = arith.constant 0 : i32
    %c0_i32_0 = arith.constant 0 : i32
    %c0_i32_1 = arith.constant 0 : i32
    return %c0_i32, %c0_i32_0 : i32, i32
  }
  func.func @transform_5(%arg0: i32) -> (i32, i32) {
    %c0_i32 = arith.constant 0 : i32
    %c0_i32_0 = arith.constant 0 : i32
    %c0_i32_1 = arith.constant 0 : i32
    return %c0_i32, %c0_i32_0 : i32, i32
  }
  func.func @transform_6(%arg0: i32) -> (i32, i32) {
    %c0_i32 = arith.constant 0 : i32
    %c0_i32_0 = arith.constant 0 : i32
    %c0_i32_1 = arith.constant 0 : i32
    return %c0_i32, %c0_i32_0 : i32, i32
  }
  func.func @transform_7(%arg0: i32) -> (i32, i32) {
    %c0_i32 = arith.constant 0 : i32
    %c0_i32_0 = arith.constant 0 : i32
    %c0_i32_1 = arith.constant 0 : i32
    return %c0_i32, %c0_i32_0 : i32, i32
  }
  func.func @transform_8(%arg0: i32) -> (i32, i32) {
    %c0_i32 = arith.constant 0 : i32
    %c0_i32_0 = arith.constant 0 : i32
    %c0_i32_1 = arith.constant 0 : i32
    return %c0_i32, %c0_i32_0 : i32, i32
  }
  func.func @transform_9(%arg0: i32) -> (i32, i32) {
    %c0_i32 = arith.constant 0 : i32
    %c0_i32_0 = arith.constant 0 : i32
    return %arg0, %c0_i32 : i32, i32
  }
}

</mosaic_0001>

<bundles_post_ra>
// kernel: tpu_custom_call.1
= control target key start
LH: loop header
LB: loop body
LE: loop exit
PB: predicated region body
PF: predicated region fallthrough
CT: control target
= control target key end

     0   :  { %s1561_s0 = inlined_call_operand.vmem [shape: f32[8,1024], index: 0, kind: input, shape index: {}]   ;;  %s1562_s1 = inlined_call_operand.vmem [shape: bf16[1024,32], index: 1, kind: input, shape index: {}]   ;;  %s1563_s2 = inlined_call_operand.vmem [shape: f32[1,32], index: 2, kind: input, shape index: {}]   ;;  %s1564_s3 = inlined_call_operand.vmem [shape: bf16[32,32], index: 3, kind: input, shape index: {}]   ;;  %s1565_s4 = inlined_call_operand.vmem [shape: f32[1,32], index: 4, kind: input, shape index: {}]   ;;  %s1566_s5 = inlined_call_operand.vmem [shape: bf16[32,32], index: 5, kind: input, shape index: {}]   ;;  %s1567_s6 = inlined_call_operand.vmem [shape: f32[1,32], index: 6, kind: input, shape index: {}]   ;;  %s1568_s7 = inlined_call_operand.vmem [shape: bf16[32,128], index: 7, kind: input, shape index: {}]   ;;  %s1569_s8 = inlined_call_operand.vmem [shape: f32[1,128], index: 8, kind: input, shape index: {}]   ;;  %s1570_s9 = inlined_call_operand.hbm [shape: f32[8,128], index: 9, kind: output, shape index: {}]  }
   0x1   :  { %v1150_v0 = vld [vmem:[%s1562_s1 + $0x40] sm:$0xff]   ;;  %v1154_v4 = vld [vmem:[%s1562_s1 + $0x48] sm:$0xff]   ;;  %v1158_v8 = vld [vmem:[%s1562_s1 + $0x50] sm:$0xff]  }
   0x2   :  { %v1151_v1 = vld [vmem:[%s1562_s1 + $0xc0] sm:$0xff]   ;;  %1026 = vmatprep.subr.bf16.mxu0 %v1150_v0  ;;  %v1155_v5 = vld [vmem:[%s1562_s1 + $0xc8] sm:$0xff]   ;;  %v1159_v9 = vld [vmem:[%s1562_s1 + $0xd0] sm:$0xff]  }
   0x3   :  { %v1152_v2 = vld [vmem:[%s1562_s1] sm:$0xff]   ;;  %1048 = vmatprep.subr.bf16.mxu1 %v1151_v1  ;;  %v1156_v6 = vld [vmem:[%s1562_s1 + $0x8] sm:$0xff]   ;;  %v1160_v10 = vld [vmem:[%s1562_s1 + $0x10] sm:$0xff]  }
   0x4   :  { %v1153_v3 = vld [vmem:[%s1562_s1 + $0x80] sm:$0xff]   ;;  %1027 = vmatpush3.bf16.msra.mxu0 %v1152_v2  ;;  %v1157_v7 = vld [vmem:[%s1562_s1 + $0x88] sm:$0xff]   ;;  %v1161_v11 = vld [vmem:[%s1562_s1 + $0x90] sm:$0xff]  }
   0x5   :  { %1049 = vmatpush3.bf16.msra.mxu1 %v1153_v3  ;;  %1028 = vmatprep.subr.bf16.mxu0 %v1154_v4  ;;  %v1162_v12 = vld [vmem:[%s1562_s1 + $0x58] sm:$0xff]   ;;  %v1166_v16 = vld [vmem:[%s1562_s1 + $0x60] sm:$0xff]   ;;  %v1170_v20 = vld [vmem:[%s1562_s1 + $0x68] sm:$0xff]  }
   0x6   :  { %1050 = vmatprep.subr.bf16.mxu1 %v1155_v5  ;;  %v1163_v13 = vld [vmem:[%s1562_s1 + $0xd8] sm:$0xff]   ;;  %v1167_v17 = vld [vmem:[%s1562_s1 + $0xe0] sm:$0xff]   ;;  %v1171_v21 = vld [vmem:[%s1562_s1 + $0xe8] sm:$0xff]  }
   0x7   :  { %v1164_v14 = vld [vmem:[%s1562_s1 + $0x18] sm:$0xff]   ;;  %v1168_v18 = vld [vmem:[%s1562_s1 + $0x20] sm:$0xff]   ;;  %v1172_v22 = vld [vmem:[%s1562_s1 + $0x28] sm:$0xff]  }
   0x8   :  { %1029 = vmatpush3.bf16.msra.mxu0 %v1156_v6  ;;  %v1165_v15 = vld [vmem:[%s1562_s1 + $0x98] sm:$0xff]   ;;  %v1169_v19 = vld [vmem:[%s1562_s1 + $0xa0] sm:$0xff]   ;;  %v1173_v23 = vld [vmem:[%s1562_s1 + $0xa8] sm:$0xff]  }
   0x9   :  { %1051 = vmatpush3.bf16.msra.mxu1 %v1157_v7  ;;  %1030 = vmatprep.subr.bf16.mxu0 %v1158_v8  ;;  %v1174_v24 = vld [vmem:[%s1562_s1 + $0x70] sm:$0xff]   ;;  %v1178_v28 = vld [vmem:[%s1562_s1 + $0x78] sm:$0xff]   ;;  %v35_v32 = vld [vmem:[%s1561_s0 + $0x8] sm:$0xff] }
   0xa   :  { %1052 = vmatprep.subr.bf16.mxu1 %v1159_v9  ;;  %v1175_v25 = vld [vmem:[%s1562_s1 + $0xf0] sm:$0xff]   ;;  %v1179_v29 = vld [vmem:[%s1562_s1 + $0xf8] sm:$0xff]   ;;  %v34_v34 = vld [vmem:[%s1561_s0] sm:$0xff]  ;;  %v172_v35 = vpack.c.bf16 %v35_v32, %v35_v32 }
   0xb   :  { %v1176_v26 = vld [vmem:[%s1562_s1 + $0x30] sm:$0xff]   ;;  %v1180_v30 = vld [vmem:[%s1562_s1 + $0x38] sm:$0xff]   ;;  %v171_v37 = vpack.c.bf16 %v34_v34, %v34_v34  ;;  %v1182_v40 = vld [vmem:[%s1562_s1 + $0x140] sm:$0xff]  }
   0xc   :  { %1031 = vmatpush3.bf16.msra.mxu0 %v1160_v10  ;;  %v1177_v27 = vld [vmem:[%s1562_s1 + $0xb0] sm:$0xff]   ;;  %v1181_v31 = vld [vmem:[%s1562_s1 + $0xb8] sm:$0xff]   ;;  %601 = vmatprep.mubr.bf16.mxu0 %v172_v35  ;;  %v1183_v41 = vld [vmem:[%s1562_s1 + $0x1c0] sm:$0xff]  }
   0xd   :  { %1053 = vmatpush3.bf16.msra.mxu1 %v1161_v11  ;;  %1032 = vmatprep.subr.bf16.mxu0 %v1162_v12  ;;  %v37_v33 = vld [vmem:[%s1561_s0 + $0x18] sm:$0xff]  ;;  %v36_v38 = vld [vmem:[%s1561_s0 + $0x10] sm:$0xff]  ;;  %v1184_v42 = vld [vmem:[%s1562_s1 + $0x100] sm:$0xff]  }
   0xe   :  { %1054 = vmatprep.subr.bf16.mxu1 %v1163_v13  ;;  %v174_v36 = vpack.c.bf16 %v37_v33, %v37_v33  ;;  %v173_v39 = vpack.c.bf16 %v36_v38, %v36_v38  ;;  %v1185_v43 = vld [vmem:[%s1562_s1 + $0x180] sm:$0xff]   ;;  %v1186_v44 = vld [vmem:[%s1562_s1 + $0x148] sm:$0xff]   ;;  %v1190_v48 = vld [vmem:[%s1562_s1 + $0x150] sm:$0xff]  }
   0xf   :  { %v1187_v45 = vld [vmem:[%s1562_s1 + $0x1c8] sm:$0xff]   ;;  %v1191_v49 = vld [vmem:[%s1562_s1 + $0x1d0] sm:$0xff]   ;;  %v1194_v52 = vld [vmem:[%s1562_s1 + $0x158] sm:$0xff]  }
  0x10   :  { %1033 = vmatpush3.bf16.msra.mxu0 %v1164_v14  ;;  %641 = vmatprep.mubr.bf16.mxu1 %v174_v36  ;;  %v1188_v46 = vld [vmem:[%s1562_s1 + $0x108] sm:$0xff]   ;;  %v1192_v50 = vld [vmem:[%s1562_s1 + $0x110] sm:$0xff]   ;;  %v1195_v53 = vld [vmem:[%s1562_s1 + $0x1d8] sm:$0xff]  }
  0x11   :  { %1055 = vmatpush3.bf16.msra.mxu1 %v1165_v15  ;;  %1034 = vmatprep.subr.bf16.mxu0 %v1166_v16  ;;  %v1189_v47 = vld [vmem:[%s1562_s1 + $0x188] sm:$0xff]   ;;  %v1193_v51 = vld [vmem:[%s1562_s1 + $0x190] sm:$0xff]   ;;  %v1196_v54 = vld [vmem:[%s1562_s1 + $0x118] sm:$0xff]  }
  0x12   :  { %1056 = vmatprep.subr.bf16.mxu1 %v1167_v17  ;;  %v1197_v55 = vld [vmem:[%s1562_s1 + $0x198] sm:$0xff]   ;;  %v1198_v56 = vld [vmem:[%s1562_s1 + $0x160] sm:$0xff]   ;;  %v1202_v60 = vld [vmem:[%s1562_s1 + $0x168] sm:$0xff]  }
  0x13   :  { %v1199_v57 = vld [vmem:[%s1562_s1 + $0x1e0] sm:$0xff]   ;;  %v1203_v61 = vld [vmem:[%s1562_s1 + $0x1e8] sm:$0xff]   ;;  %v1206_v0 = vld [vmem:[%s1562_s1 + $0x170] sm:$0xff]  }
  0x14   :  { %1035 = vmatpush3.bf16.msra.mxu0 %v1168_v18  ;;  %v1200_v58 = vld [vmem:[%s1562_s1 + $0x120] sm:$0xff]   ;;  %v1204_v62 = vld [vmem:[%s1562_s1 + $0x128] sm:$0xff]   ;;  %v1207_v1 = vld [vmem:[%s1562_s1 + $0x1f0] sm:$0xff]  }
  0x15   :  { %1057 = vmatpush3.bf16.msra.mxu1 %v1169_v19  ;;  %1036 = vmatprep.subr.bf16.mxu0 %v1170_v20  ;;  %v1201_v59 = vld [vmem:[%s1562_s1 + $0x1a0] sm:$0xff]   ;;  %v1205_v63 = vld [vmem:[%s1562_s1 + $0x1a8] sm:$0xff]   ;;  %v1208_v2 = vld [vmem:[%s1562_s1 + $0x130] sm:$0xff]  }
  0x16   :  { %1058 = vmatprep.subr.bf16.mxu1 %v1171_v21  ;;  %v1209_v3 = vld [vmem:[%s1562_s1 + $0x1b0] sm:$0xff]   ;;  %v1210_v4 = vld [vmem:[%s1562_s1 + $0x178] sm:$0xff]   ;;  %v39_v8 = vld [vmem:[%s1561_s0 + $0x28] sm:$0xff] }
  0x17   :  { %v1211_v5 = vld [vmem:[%s1562_s1 + $0x1f8] sm:$0xff]   ;;  %v176_v10 = vpack.c.bf16 %v39_v8, %v39_v8  ;;  %v38_v12 = vld [vmem:[%s1561_s0 + $0x20] sm:$0xff]  ;;  %v40_v13 = vld [vmem:[%s1561_s0 + $0x30] sm:$0xff] }
  0x18   :  { %1037 = vmatpush3.bf16.msra.mxu0 %v1172_v22  ;;  %v1212_v6 = vld [vmem:[%s1562_s1 + $0x138] sm:$0xff]   ;;  %v175_v14 = vpack.c.bf16 %v38_v12, %v38_v12  ;;  %v177_v15 = vpack.c.bf16 %v40_v13, %v40_v13 }
  0x19   :  { %1059 = vmatpush3.bf16.msra.mxu1 %v1173_v23  ;;  %1038 = vmatprep.subr.bf16.mxu0 %v1174_v24  ;;  %v1213_v7 = vld [vmem:[%s1562_s1 + $0x1b8] sm:$0xff]  }
  0x1a   :  { %1060 = vmatprep.subr.bf16.mxu1 %v1175_v25  ;;  %v41_v9 = vld [vmem:[%s1561_s0 + $0x38] sm:$0xff] }
  0x1b   :  { %v178_v11 = vpack.c.bf16 %v41_v9, %v41_v9 }
  0x1c   :  { %1039 = vmatpush3.bf16.msra.mxu0 %v1176_v26 }
  0x1d   :  { %1061 = vmatpush3.bf16.msra.mxu1 %v1177_v27  ;;  %1040 = vmatprep.subr.bf16.mxu0 %v1178_v28 }
  0x1e   :  { %1062 = vmatprep.subr.bf16.mxu1 %v1179_v29 }
  0x20   :  { %1041 = vmatpush3.bf16.msra.mxu0 %v1180_v30 }
  0x21   :  { %1063 = vmatpush3.bf16.msra.mxu1 %v1181_v31  ;;  %1070 = vmatprep.subr.bf16.mxu0 %v1182_v40 }
  0x22   :  { %1092 = vmatprep.subr.bf16.mxu1 %v1183_v41 }
  0x23   :  { %602 = vmatmul.mubr.bf16.vlgmr.msra.gmra.mrb[0].mxu0 %v171_v37 }
  0x24   :  { %642 = vmatmul.mubr.bf16.vlgmr.msra.gmra.mrb[0].mxu1 %v173_v39  ;;  %1071 = vmatpush3.bf16.msra.mxu0 %v1184_v42 }
  0x25   :  { %1093 = vmatpush3.bf16.msra.mxu1 %v1185_v43  ;;  %1072 = vmatprep.subr.bf16.mxu0 %v1186_v44 }
  0x26   :  { %1094 = vmatprep.subr.bf16.mxu1 %v1187_v45  ;;  %681 = vmatprep.mubr.bf16.mxu0 %v176_v10 }
  0x27   :  { %721 = vmatprep.mubr.bf16.mxu1 %v178_v11 }
  0x28   :  { %1073 = vmatpush3.bf16.msra.mxu0 %v1188_v46 }
  0x29   :  { %1095 = vmatpush3.bf16.msra.mxu1 %v1189_v47  ;;  %1074 = vmatprep.subr.bf16.mxu0 %v1190_v48 }
  0x2a   :  { %1096 = vmatprep.subr.bf16.mxu1 %v1191_v49 }
  0x2c   :  { %1075 = vmatpush3.bf16.msra.mxu0 %v1192_v50 }
  0x2d   :  { %1097 = vmatpush3.bf16.msra.mxu1 %v1193_v51  ;;  %1076 = vmatprep.subr.bf16.mxu0 %v1194_v52 }
  0x2e   :  { %1098 = vmatprep.subr.bf16.mxu1 %v1195_v53 }
  0x30   :  { %1077 = vmatpush3.bf16.msra.mxu0 %v1196_v54 }
  0x31   :  { %1099 = vmatpush3.bf16.msra.mxu1 %v1197_v55  ;;  %1078 = vmatprep.subr.bf16.mxu0 %v1198_v56 }
  0x32   :  { %1100 = vmatprep.subr.bf16.mxu1 %v1199_v57 }
  0x34   :  { %1079 = vmatpush3.bf16.msra.mxu0 %v1200_v58 }
  0x35   :  { %1101 = vmatpush3.bf16.msra.mxu1 %v1201_v59  ;;  %1080 = vmatprep.subr.bf16.mxu0 %v1202_v60 }
  0x36   :  { %1102 = vmatprep.subr.bf16.mxu1 %v1203_v61 }
  0x38   :  { %1081 = vmatpush3.bf16.msra.mxu0 %v1204_v62 }
  0x39   :  { %1103 = vmatpush3.bf16.msra.mxu1 %v1205_v63  ;;  %1082 = vmatprep.subr.bf16.mxu0 %v1206_v0 }
  0x3a   :  { %1104 = vmatprep.subr.bf16.mxu1 %v1207_v1 }
  0x3c   :  { %1083 = vmatpush3.bf16.msra.mxu0 %v1208_v2 }
  0x3d   :  { %1105 = vmatpush3.bf16.msra.mxu1 %v1209_v3  ;;  %1084 = vmatprep.subr.bf16.mxu0 %v1210_v4 }
  0x3e   :  { %1106 = vmatprep.subr.bf16.mxu1 %v1211_v5 }
  0x40   :  { %1085 = vmatpush3.bf16.msra.mxu0 %v1212_v6 }
  0x41   :  { %1107 = vmatpush3.bf16.msra.mxu1 %v1213_v7 }
  0x43   :  { %682 = vmatmul.mubr.bf16.vlgmr.msra.gmra.mrb[4].mxu0 %v175_v14 }
  0x44   :  { %722 = vmatmul.mubr.bf16.vlgmr.msra.gmra.mrb[4].mxu1 %v177_v15 }
  0x45   :  { %14 = vsyncpa [#allocation3], 0  ;;  %v1214_v16 = vld [vmem:[%s1564_s3] sm:$0xff]   ;;  %v1244_v17 = vmov 0.0   ;;  %v1215_v18 = vld [vmem:[%s1564_s3 + $0x8] sm:$0xff]   ;;  %vm1245_vm0 = vmmov 0  }
  0x46   :  { %1123 = vmatprep.subr.bf16.mxu0 %v1244_v17  ;;  %1131 = vmatprep.subr.bf16.mxu1 %v1244_v17  ;;  %v1216_v19 = vld [vmem:[%s1566_s5] sm:$0xff]   ;;  %vm754_vm1 = vcmask 261120   ;;  %v1217_v47 = vld [vmem:[%s1566_s5 + $0x8] sm:$0xff]   ;;  %s1246_s20 = smov [#allocation2]  }
  0x47   :  { %1124 = vmatpush3.bf16.msra.mxu0 %v1214_v16  ;;  %1127 = vmatprep.mubr.msk.bf16.mxu0 %vm1245_vm0, %v1244_v17  ;;  %v949_v22 = vld [vmem:[%s1563_s2] ss:$0 sm:$0xff]  ;;  %v1219_v57 = vld [vmem:[%s1568_s7 + $0x8] sm:$0xff]  }
  0x48   :  { %1125 = vmatprep.subr.bf16.mxu0 %v1244_v17  ;;  %1135 = vmatprep.mubr.msk.bf16.mxu1 %vm1245_vm0, %v1244_v17  ;;  %v1218_v48 = vld [vmem:[%s1568_s7] sm:$0xff]   ;;  %s941_s7 = sshll.u32 %s1246_s20, 4  ;;  %s942_s7 = int_to_ptr.vmem [resolvable:$true] %s941_s7 }
  0x49   :  { %1132 = vmatpush3.bf16.msra.mxu1 %v1216_v19  ;;  %v1014_v49 = vld [vmem:[%s1565_s4] ss:$0 sm:$0xff]  ;;  %p1225_p1 = scmp.lt.s32.totalorder %s942_s7, %s942_s7 }
  0x4a   :  { %1133 = vmatprep.subr.bf16.mxu1 %v1244_v17  ;;  %v1018_v58 = vld [vmem:[%s1567_s6] ss:$0 sm:$0xff]  ;;  %s1220_s6 = scalar_lea.vmem %s942_s7, 128 }
  0x4b   :  { %1126 = vmatpush3.bf16.msra.mxu0 %v1215_v18  ;;  %v1022_v2 = vld [vmem:[%s1569_s8] ss:$0 sm:$0xff]  ;;  %p1221_p0 = scmp.ne.s32.totalorder %s942_s7, %s1220_s6  ;;  %p1226_p2 = scmp.lt.s32.totalorder %s1220_s6, %s1220_s6 }
  0x4c   :  { %1139 = vmatprep.subr.bf16.mxu0 %v1244_v17 }
  0x4d   :  { %1134 = vmatpush3.bf16.msra.mxu1 %v1217_v47  ;;  %p1227_p3 = por %p1226_p2, %p1225_p1 }
  0x4f   :  { %p1228_p4 = pnand %p1227_p3, %p1221_p0 }
  0xf6   :  { %v1042_v20 = vpop.f32.mrb[0].mxu0 }
  0xf7   :  { %v1064_v21 = vpop.f32.mrb[0].mxu1  ;;  %v1043_v23 = vpop.f32.mrb[1].mxu0 }
  0xf8   :  { %v1065_v24 = vpop.f32.mrb[1].mxu1  ;;  %v1044_v25 = vadd.f32 %v1043_v23, %v1042_v20  ;;  %v1045_v27 = vpop.f32.mrb[2].mxu0 }
  0xf9   :  { %v1066_v26 = vadd.f32 %v1065_v24, %v1064_v21  ;;  %v1067_v28 = vpop.f32.mrb[2].mxu1  ;;  %v1046_v29 = vpop.f32.mrb[3].mxu0 }
  0xfa   :  { %v1068_v30 = vpop.f32.mrb[3].mxu1  ;;  %v604_v31 = vadd.f32 %v1044_v25, %v949_v22 }
  0xfc   :  { %v644_v32 = vadd.f32 %v1066_v26, %v604_v31 }
 0x116   :  { %v1086_v33 = vpop.f32.mrb[4].mxu0 }
 0x117   :  { %v1108_v34 = vpop.f32.mrb[4].mxu1  ;;  %v1087_v35 = vpop.f32.mrb[5].mxu0 }
 0x118   :  { %v1088_v36 = vadd.f32 %v1087_v35, %v1086_v33  ;;  %v1109_v37 = vpop.f32.mrb[5].mxu1  ;;  %v1089_v38 = vpop.f32.mrb[6].mxu0 }
 0x119   :  { %v1110_v39 = vadd.f32 %v1109_v37, %v1108_v34  ;;  %v1111_v40 = vpop.f32.mrb[6].mxu1  ;;  %v1090_v41 = vpop.f32.mrb[7].mxu0 }
 0x11a   :  { %v684_v42 = vadd.f32 %v1088_v36, %v644_v32  ;;  %v1112_v43 = vpop.f32.mrb[7].mxu1 }
 0x11c   :  { %v724_v44 = vadd.f32 %v1110_v39, %v684_v42 }
 0x11e   :  { %v729_v45 = vmax.f32 %v724_v44, 0.0 }
 0x120   :  { %v735_v46 = vpack.c.bf16 %v729_v45, %v729_v45 }
 0x122   :  { %1128 = vmatmul.mubr.msk.bf16.vlgmr.msra.gmra.mrb[8].mxu0 %vm754_vm1, %v735_v46 }
 0x123   :  { %1143 = vmatprep.mubr.msk.bf16.mxu0 %vm1245_vm0, %v1244_v17  ;;  %1140 = vmatpush3.bf16.msra.mxu0 %v1218_v48 }
 0x124   :  { %1141 = vmatprep.subr.bf16.mxu0 %v1244_v17 }
 0x127   :  { %1142 = vmatpush3.bf16.msra.mxu0 %v1219_v57 }
 0x1f5   :  { %v792_v50 = vpop.f32.mrb[8].mxu0 }
 0x1f6   :  { %v793_v51 = vadd.f32 %v1014_v49, %v792_v50  ;;  %v1129_v52 = vpop.f32.mrb[9].mxu0 }
 0x1f7   :  { %v795_v53 = vpop.f32.mrb[10].mxu0 }
 0x1f8   :  { %v798_v54 = vmax.f32 %v793_v51, 0.0  ;;  %v1130_v55 = vpop.f32.mrb[11].mxu0 }
 0x1fa   :  { %v804_v56 = vpack.c.bf16 %v798_v54, %v798_v54 }
 0x1fc   :  { %1136 = vmatmul.mubr.msk.bf16.vlgmr.msra.gmra.mrb[8].mxu1 %vm754_vm1, %v804_v56 }
 0x2cf   :  { %v860_v59 = vpop.f32.mrb[8].mxu1 }
 0x2d0   :  { %v861_v60 = vadd.f32 %v1018_v58, %v860_v59  ;;  %v1137_v61 = vpop.f32.mrb[9].mxu1 }
 0x2d1   :  { %v863_v62 = vpop.f32.mrb[10].mxu1 }
 0x2d2   :  { %v866_v63 = vmax.f32 %v861_v60, 0.0  ;;  %v1138_v0 = vpop.f32.mrb[11].mxu1 }
 0x2d4   :  { %v872_v1 = vpack.c.bf16 %v866_v63, %v866_v63 }
 0x2d6   :  { %1144 = vmatmul.mubr.msk.bf16.vlgmr.msra.gmra.mrb[12].mxu0 %vm754_vm1, %v872_v1 }
 0x3a9   :  { %v928_v3 = vpop.f32.mrb[12].mxu0 }
 0x3aa   :  { %v929_v4 = vadd.f32 %v1022_v2, %v928_v3  ;;  %v1145_v5 = vpop.f32.mrb[13].mxu0 }
 0x3ab   :  { %v931_v6 = vpop.f32.mrb[14].mxu0 }
 0x3ac   :  { %934 = vst [vmem:[#allocation2] sm:$0xff] %v929_v4  ;;  %v1146_v7 = vpop.f32.mrb[15].mxu0 }
 0x3ad   :  { %1231 = shalt.err (!%p1228_p4)
}
 0x3ae   :  { %s1232_s8 = scalar_lea.hbm %s1570_s9, 128 }
 0x3af   :  { %p1233_p5 = scmp.ne.s32.totalorder %s1570_s9, %s1232_s8  ;;  %p1236_p6 = scmp.lt.u32.totalorder %s1232_s8, %s1570_s9 }
 0x3b1   :  { %p1238_p7 = pnand %p1236_p6, %p1233_p5 }
 0x3b3   :  { %1241 = shalt.err (!%p1238_p7)
}
 0x3b4   :  { %944 = dma.vmem_to_hbm [thread:$0]  %s942_s7, 128, %s1570_s9, [#allocation3]  }
 0x3b5   :  { %1242 = dma.done.wait [#allocation3], 128  }
 0x3b6   :  { %1243 = vsyncadd [#allocation3], 4294967168 }
 0x3b7   :  { %948 = vsyncpa [#allocation3], 1 }

</bundles_post_ra>
